<compile_context>
chip_gen: v7x
topology: tpu7x:2x2x1
jax: 0.10.0
libtpu: 0.0.40
codegen_flags: <defaults>
</compile_context>

<pallas_src>
from functools import partial

import jax
import jax.numpy as jnp
from jax.experimental import pallas as pl
from jax.experimental.pallas import tpu as pltpu

HIDDEN_SIZE = 32
MAX_ORDER = 8
LANES = 128  # one full vreg lane width per packed row


def _oom_kernel(packed_ref, out_ref, *, h_size):
    """packed_ref: (max_order, LANES) f32 slab.  out_ref: (1, 1) f32.

    Slab row j layout:
      lanes 0..H-1 : W2[j, :] * h[:]          (layer 1 pre-applied host-side)
      lane  H      : b2[j]
      lane  H+1    : 10**j  (exact)
      lanes H+2..  : zeros
    """
    slab = packed_ref[...]                                         # (M, LANES), one vreg

    # logits[j] = sum_k W2[j,k] * h[k] + b2[j]   (lanes 0..H inclusive)
    logits = jnp.sum(slab[:, : h_size + 1], axis=1, keepdims=True)  # (M, 1)
    logits = jnp.maximum(logits, 0.0)                               # trailing ReLU

    # Numerically-stable softmax over the order axis, fused with the
    # magnitude-weighted sum: out = sum(e * 10**j) / sum(e).
    mx = jnp.max(logits, axis=0, keepdims=True)                     # (1, 1)
    e = jnp.exp(logits - mx)                                        # (M, 1)
    mags = slab[:, h_size + 1 : h_size + 2]                         # (M, 1) exact 10**j
    num = jnp.sum(e * mags, axis=0, keepdims=True)                  # (1, 1)
    den = jnp.sum(e, axis=0, keepdims=True)                         # (1, 1)
    out_ref[...] = num / den                                        # exact divide


def _pack_params(w1, b1, w2, b2):
    """Fold layer 1 and pack everything into one (max_order, LANES) f32 tile."""
    h_size, m_order = w1.shape[0], w2.shape[0]
    assert w1.shape == (h_size, 1), w1.shape        # nn.Linear(1, H).weight
    assert b1.shape == (h_size,), b1.shape
    assert w2.shape == (m_order, h_size), w2.shape  # nn.Linear(H, M).weight
    assert b2.shape == (m_order,), b2.shape
    assert h_size + 2 <= LANES

    w1 = w1.astype(jnp.float32)
    b1 = b1.astype(jnp.float32)
    w2 = w2.astype(jnp.float32)
    b2 = b2.astype(jnp.float32)

    # Layer 1 on the constant dummy = ones(1, 1): h = relu(W1[:, 0] + b1).
    h = jnp.maximum(w1[:, 0] + b1, 0.0)                             # (H,)

    # Exact powers of ten (computed with Python ints, like torch's int buffer).
    mags = jnp.asarray([float(10 ** j) for j in range(m_order)], jnp.float32)

    slab = jnp.zeros((m_order, LANES), jnp.float32)
    slab = slab.at[:, :h_size].set(w2 * h[None, :])   # layer-2 weights * h
    slab = slab.at[:, h_size].set(b2)                 # bias lane
    slab = slab.at[:, h_size + 1].set(mags)           # magnitude lane (excluded from reduce)
    return slab


@jax.jit
def order_of_magnitude_forward(w1, b1, w2, b2):
    """PyTorch-native shapes: w1 (H, 1), b1 (H,), w2 (M, H), b2 (M,) -> (1, 1)."""
    h_size = w1.shape[0]
    packed = _pack_params(w1, b1, w2, b2)
    return pl.pallas_call(
        partial(_oom_kernel, h_size=h_size),
        out_shape=jax.ShapeDtypeStruct((1, 1), jnp.float32),
        in_specs=[pl.BlockSpec(memory_space=pltpu.MemorySpace.VMEM)],
        out_specs=pl.BlockSpec(memory_space=pltpu.MemorySpace.VMEM),
        cost_estimate=pl.CostEstimate(
            flops=600, transcendentals=9, bytes_accessed=4096 + 4),
    )(packed)


def _reference(w1, b1, w2, b2):
    h = jnp.maximum(jnp.ones((1, 1), jnp.float32) @ w1.T + b1[None, :], 0.0)
    logits = jnp.maximum(h @ w2.T + b2[None, :], 0.0)
    probs = jax.nn.softmax(logits, axis=1)
    mags = jnp.asarray([float(10 ** j) for j in range(w2.shape[0])], jnp.float32)[None, :]
    return jnp.sum(probs * mags, axis=1, keepdims=True)


if __name__ == "__main__":
    key = jax.random.PRNGKey(0)
    k1, k2, k3, k4 = jax.random.split(key, 4)

    # PyTorch nn.Linear default init: U(-1/sqrt(fan_in), 1/sqrt(fan_in)).
    bound1 = 1.0                              # fan_in = 1
    bound2 = 1.0 / (HIDDEN_SIZE ** 0.5)       # fan_in = hidden_size

    # PyTorch-native layouts: weight (out_features, in_features), bias (out_features,)
    w1 = jax.random.uniform(k1, (HIDDEN_SIZE, 1), jnp.float32, -bound1, bound1)
    b1 = jax.random.uniform(k2, (HIDDEN_SIZE,), jnp.float32, -bound1, bound1)
    w2 = jax.random.uniform(k3, (MAX_ORDER, HIDDEN_SIZE), jnp.float32, -bound2, bound2)
    b2 = jax.random.uniform(k4, (MAX_ORDER,), jnp.float32, -bound2, bound2)

    out = order_of_magnitude_forward(w1, b1, w2, b2)
    out = jax.block_until_ready(out)

    ref = _reference(w1, b1, w2, b2)
    assert out.shape == (1, 1), out.shape
    assert jnp.allclose(out, ref, rtol=1e-4, atol=1e-5), (out, ref)

    print("KERNEL_OK")
</pallas_src>

<mosaic_0001>
module attributes {stable_mosaic.version = 11 : i64} {
  func.func @_oom_kernel(%arg0: memref<8x128xf32, #tpu.memory_space<vmem>>, %arg1: memref<1x1xf32, #tpu.memory_space<vmem>>) attributes {dimension_semantics = [], scalar_prefetch = 0 : i64, scratch_operands = 0 : i64, tpu.core_type = #tpu.core_type<tc>} {
    %c0 = arith.constant 0 : index
    %c0_0 = arith.constant 0 : index
    %0 = vector.load %arg0[%c0, %c0_0] : memref<8x128xf32, #tpu.memory_space<vmem>>, vector<8x128xf32>
    %1 = vector.extract_strided_slice %0 {offsets = [0, 0], sizes = [8, 33], strides = [1, 1]} : vector<8x128xf32> to vector<8x33xf32>
    %cst = arith.constant dense<0.000000e+00> : vector<8xf32>
    %2 = vector.multi_reduction <add>, %1, %cst [1] : vector<8x33xf32> to vector<8xf32>
    %3 = vector.shape_cast %2 : vector<8xf32> to vector<8x1xf32>
    %cst_1 = arith.constant 0.000000e+00 : f32
    %4 = vector.broadcast %cst_1 : f32 to vector<8x1xf32>
    %5 = arith.maximumf %3, %4 : vector<8x1xf32>
    %cst_2 = arith.constant dense<0xFF800000> : vector<1xf32>
    %6 = vector.multi_reduction <maximumf>, %5, %cst_2 [0] : vector<8x1xf32> to vector<1xf32>
    %7 = vector.shape_cast %6 : vector<1xf32> to vector<1x1xf32>
    %8 = vector.broadcast %7 : vector<1x1xf32> to vector<8x1xf32>
    %9 = arith.subf %5, %8 : vector<8x1xf32>
    %10 = math.exp %9 : vector<8x1xf32>
    %11 = vector.extract_strided_slice %0 {offsets = [0, 33], sizes = [8, 1], strides = [1, 1]} : vector<8x128xf32> to vector<8x1xf32>
    %12 = arith.mulf %10, %11 : vector<8x1xf32>
    %cst_3 = arith.constant dense<0.000000e+00> : vector<1xf32>
    %13 = vector.multi_reduction <add>, %12, %cst_3 [0] : vector<8x1xf32> to vector<1xf32>
    %14 = vector.shape_cast %13 : vector<1xf32> to vector<1x1xf32>
    %cst_4 = arith.constant dense<0.000000e+00> : vector<1xf32>
    %15 = vector.multi_reduction <add>, %10, %cst_4 [0] : vector<8x1xf32> to vector<1xf32>
    %16 = vector.shape_cast %15 : vector<1xf32> to vector<1x1xf32>
    %17 = arith.divf %14, %16 : vector<1x1xf32>
    %c0_5 = arith.constant 0 : index
    %c0_6 = arith.constant 0 : index
    %18 = vector.load %arg1[%c0_5, %c0_6] : memref<1x1xf32, #tpu.memory_space<vmem>>, vector<1x1xf32>
    tpu.vector_store %arg1[%c0_5, %c0_6], %17 {strides = array<i32>} : memref<1x1xf32, #tpu.memory_space<vmem>>, vector<1x1xf32>,
    return
  }
}

</mosaic_0001>

<bundles_post_ra>
// kernel: order_of_magnitude_forward.1
= control target key start
LH: loop header
LB: loop body
LE: loop exit
PB: predicated region body
PF: predicated region fallthrough
CT: control target
= control target key end

     0   :  { %vm10_vm0 = vcmask 269312   ;;  %s118_s0 = inlined_call_operand.vmem [shape: f32[8,128], index: 0, kind: input, shape index: {}]   ;;  %s119_s1 = inlined_call_operand.hbm [shape: f32[1,1], index: 1, kind: output, shape index: {}]  }
   0x1   :  { %v9_v0 = vld [vmem:[%s118_s0] sm:$0xff] }
   0x2   :  { %6 = vsyncpa [#allocation3], 0  ;;  %v11_v1 = vsel %vm10_vm0, %v9_v0, 0.0  ;;  %vm25_vm1 = vcmask 277768   ;;  %s91_s0 = smov 95   ;;  %s92_s8 = smov [#allocation2]  }
   0x3   :  { %12 = vadd.xlane.f32.xlu0 %v11_v1  ;;  %s53_s9 = sshll.u32 %s92_s8, 4  ;;  %vm45_vm2 = vcmask 0   ;;  %s54_s9 = int_to_ptr.vmem [resolvable:$true] %s53_s9 }
   0x4   :  { %s67_s10 = scalar_lea.vmem %s54_s9, 16  ;;  %s71_s11 = scalar_lea.vmem %s54_s9, 32 }
   0x5   :  { %p68_p0 = scmp.ne.s32.totalorder %s54_s9, %s67_s10  ;;  %p72_p1 = scmp.lt.s32.totalorder %s54_s9, %s54_s9 }
   0x6   :  { %p73_p2 = scmp.lt.s32.totalorder %s71_s11, %s67_s10 }
   0x8   :  { %p74_p3 = por %p73_p2, %p72_p1 }
   0xa   :  { %p75_p4 = pnand %p74_p3, %p68_p0 }
  0x90   :  { %v13_v2 = vpop.xlane.xlu0 %12 }
  0x91   :  { %v14_v3 = vmax.f32 %v13_v2, 0.0 }
  0x93   :  { %v15_v4 = vrot.slane %v14_v3, 4 }
  0x95   :  { %v16_v5 = vmax.f32 %v14_v3, %v15_v4 }
  0x97   :  { %v17_v6 = vrot.slane %v16_v5, 2 }
  0x99   :  { %v18_v7 = vmax.f32 %v16_v5, %v17_v6 }
  0x9b   :  { %v19_v8 = vrot.slane %v18_v7, 1 }
  0x9d   :  { %v20_v9 = vmax.f32 %v18_v7, %v19_v8 }
  0x9f   :  { %v21_v10 = vsub.f32 %v14_v3, %v20_v9 }
  0xa1   :  { %v22_v11 = vmul.f32 1.442695, %v21_v10 }
  0xa3   :  { %63 = vpow2.f32 %v22_v11 }
  0xad   :  { %v64_v12 = vpop.eup %63 }
  0xae   :  { %v24_v13 = vmul.f32 %v64_v12, %v9_v0  ;;  %v33_v14 = vrot.slane %v64_v12, 4 }
  0xb0   :  { %v26_v15 = vsel %vm25_vm1, %v24_v13, 0.0  ;;  %v34_v16 = vadd.f32 %v64_v12, %v33_v14 }
  0xb1   :  { %v27_v17 = vrot.slane %v26_v15, 4 }
  0xb2   :  { %v35_v18 = vrot.slane %v34_v16, 2 }
  0xb3   :  { %v28_v19 = vadd.f32 %v27_v17, %v26_v15 }
  0xb4   :  { %v36_v20 = vadd.f32 %v35_v18, %v34_v16 }
  0xb5   :  { %v29_v22 = vrot.slane %v28_v19, 2 }
  0xb6   :  { %v37_v21 = vrot.slane %v36_v20, 1 }
  0xb7   :  { %v30_v24 = vadd.f32 %v29_v22, %v28_v19 }
  0xb8   :  { %v38_v23 = vadd.f32 %v37_v21, %v36_v20 }
  0xb9   :  { %v31_v25 = vrot.slane %v30_v24, 1 }
  0xba   :  { %65 = vrcp.f32 %v38_v23 }
  0xbb   :  { %v32_v26 = vadd.f32 %v31_v25, %v30_v24 }
  0xc4   :  { %v66_v27 = vpop.eup %65 }
  0xc5   :  { %v40_v28 = vmul.f32 %v66_v27, %v32_v26 }
  0xc7   :  { %42 = vrot.lane.b32.xlu0 %v40_v28, %s91_s0 }
 0x139   :  { %v43_v29 = vpop.permute.xlu0 %42 }
 0x13a   :  { %46 = vst.msk [vmem:[#allocation2] sm:$0x1] %vm45_vm2, %v43_v29 }
 0x13b   :  { %78 = shalt.err (!%p75_p4)
}
 0x13c   :  { %s79_s14 = scalar_lea.hbm %s119_s1, 16 }
 0x13d   :  { %p80_p5 = scmp.ne.s32.totalorder %s119_s1, %s79_s14  ;;  %p83_p6 = scmp.lt.u32.totalorder %s79_s14, %s119_s1 }
 0x13f   :  { %p85_p7 = pnand %p83_p6, %p80_p5 }
 0x141   :  { %88 = shalt.err (!%p85_p7)
}
 0x142   :  { %56 = dma.vmem_to_hbm [thread:$0]  %s54_s9, 16, %s119_s1, [#allocation3]  }
 0x143   :  { %89 = dma.done.wait [#allocation3], 16  }
 0x144   :  { %90 = vsyncadd [#allocation3], 4294967280 }
 0x145   :  { %60 = vsyncpa [#allocation3], 1 }

</bundles_post_ra>
